<compile_context>
chip_gen: v7x
topology: tpu7x:2x2x1
jax: 0.10.0
libtpu: 0.0.40
codegen_flags: <defaults>
</compile_context>

<pallas_src>
import functools

import jax
import jax.numpy as jnp
from jax.experimental import pallas as pl
from jax.experimental.pallas import tpu as pltpu


def _round_up(a: int, b: int) -> int:
    return (a + b - 1) // b * b


def _avgpool_kernel(x_ref, o_ref, acc_ref, *, inv_hw, hw_tile, last_valid):
    # x_ref:   (row_tile, hw_tile) chunk in VMEM
    # o_ref:   (row_tile, 1) output block (resident across the k axis)
    # acc_ref: (row_tile, 1) f32 accumulator scratch
    k = pl.program_id(1)
    n_k = pl.num_programs(1)

    @pl.when(k == 0)
    def _init():
        acc_ref[...] = jnp.zeros_like(acc_ref)

    if last_valid == hw_tile:
        # Every hw block is fully in-bounds (hw_tile == hw, or hw % hw_tile == 0).
        acc_ref[...] += jnp.sum(x_ref[...], axis=-1, keepdims=True,
                                dtype=jnp.float32)
    else:
        @pl.when(k < n_k - 1)
        def _full_block():
            acc_ref[...] += jnp.sum(x_ref[...], axis=-1, keepdims=True,
                                    dtype=jnp.float32)

        @pl.when(k == n_k - 1)
        def _tail_block():
            # The trailing hw block is a clipped DMA: lanes >= last_valid hold
            # undefined data and MUST be masked before the reduction.
            x = x_ref[...]
            lane = jax.lax.broadcasted_iota(jnp.int32, x.shape, 1)
            x = jnp.where(lane < last_valid, x, jnp.zeros_like(x))
            acc_ref[...] += jnp.sum(x, axis=-1, keepdims=True,
                                    dtype=jnp.float32)

    @pl.when(k == n_k - 1)
    def _finalize():
        o_ref[...] = (acc_ref[...] * inv_hw).astype(o_ref.dtype)


def fast_adaptive_avg_pool2d(x, flatten: bool = False,
                             target_block_bytes: int = 4 << 20):
    """x: (N, C, H, W). Mean over (H, W).

    flatten=False -> (N, C, 1, 1)   (keepdim=True, PyTorch default)
    flatten=True  -> (N, C)
    """
    N, C, H, W = x.shape
    rows = N * C
    hw = H * W
    itemsize = jnp.dtype(x.dtype).itemsize

    x2d = x.reshape(rows, hw)

    # Dtype-aware sublane granularity: 8 (f32), 16 (bf16), 32 (int8/fp8).
    sub_min = max(8, 32 // itemsize)

    # --- hw tile (lane / reduction axis) ---------------------------------
    max_hw_tile = max(128, (target_block_bytes // (sub_min * itemsize)) // 128 * 128)
    if hw <= max_hw_tile:
        hw_tile = hw                      # one full-extent chunk, no masking
        n_k = 1
        last_valid = hw_tile
    else:
        # Balanced 128-aligned chunks: trailing-block waste < 128 lanes.
        n_k = pl.cdiv(hw, max_hw_tile)
        hw_tile = _round_up(pl.cdiv(hw, n_k), 128)
        n_k = pl.cdiv(hw, hw_tile)
        last_valid = hw - (n_k - 1) * hw_tile   # masked in-kernel if < hw_tile
    hw_tile_pad = _round_up(hw_tile, 128)       # lane-padded VMEM footprint

    # --- row tile (sublane / parallel axis) ------------------------------
    # Full per-row VMEM working set, lane padding included:
    #   2x input buffer + 2x (row,1) output buffer + f32 accumulator scratch.
    bytes_per_row = (2 * hw_tile_pad * itemsize
                     + 2 * 128 * itemsize
                     + 128 * 4)
    row_budget = 3 * target_block_bytes
    row_tile = max(sub_min, (row_budget // bytes_per_row) // sub_min * sub_min)
    # Keep at least 2 row blocks when rows allow it (v7x has 2 TensorCores).
    row_tile = min(row_tile, max(sub_min, _round_up(pl.cdiv(rows, 2), sub_min)))
    n_rows = pl.cdiv(rows, row_tile)

    # --- VMEM limit, clamped to device capacity --------------------------
    try:
        vmem_cap = pltpu.get_tpu_info().vmem_capacity_bytes
    except Exception:
        vmem_cap = 64 << 20               # conservative (v7x) fallback
    need = row_tile * bytes_per_row + (8 << 20)
    vmem_limit = int(min(max(need, 32 << 20), (vmem_cap * 3) // 4))

    out2d = pl.pallas_call(
        functools.partial(_avgpool_kernel, inv_hw=1.0 / hw,
                          hw_tile=hw_tile, last_valid=last_valid),
        out_shape=jax.ShapeDtypeStruct((rows, 1), x.dtype),
        grid=(n_rows, n_k),
        in_specs=[pl.BlockSpec((row_tile, hw_tile), lambda i, k: (i, k))],
        out_specs=pl.BlockSpec((row_tile, 1), lambda i, k: (i, 0)),
        scratch_shapes=[pltpu.VMEM((row_tile, 1), jnp.float32)],
        compiler_params=pltpu.CompilerParams(
            dimension_semantics=("parallel", "arbitrary"),
            vmem_limit_bytes=vmem_limit,
        ),
        cost_estimate=pl.CostEstimate(
            flops=rows * hw,
            transcendentals=0,
            bytes_accessed=rows * hw * itemsize + rows * itemsize,
        ),
    )(x2d)

    if flatten:
        return out2d.reshape(N, C)
    return out2d.reshape(N, C, 1, 1)


if __name__ == "__main__":
    key = jax.random.PRNGKey(0)

    # 1) Module-default shapes: (2, 4, 16, 16), keepdim and flatten variants.
    x = jax.random.normal(key, (2, 4, 16, 16), dtype=jnp.float32)
    out_keep = jax.block_until_ready(fast_adaptive_avg_pool2d(x, flatten=False))
    out_flat = jax.block_until_ready(fast_adaptive_avg_pool2d(x, flatten=True))
    ref_keep = jnp.mean(x, axis=(2, 3), keepdims=True)
    ref_flat = jnp.mean(x, axis=(2, 3), keepdims=False)
    assert out_keep.shape == (2, 4, 1, 1)
    assert out_flat.shape == (2, 4)
    assert jnp.allclose(out_keep, ref_keep, atol=1e-5, rtol=1e-5)
    assert jnp.allclose(out_flat, ref_flat, atol=1e-5, rtol=1e-5)

    # 2) Non-tile-aligned rows (15) and spatial (7x7=49): exercises clipped
    #    trailing row block + full-extent non-128 lane reduction (no padding).
    k2 = jax.random.fold_in(key, 1)
    x2 = jax.random.normal(k2, (3, 5, 7, 7), dtype=jnp.float32)
    out2 = jax.block_until_ready(fast_adaptive_avg_pool2d(x2))
    assert jnp.allclose(out2, jnp.mean(x2, axis=(2, 3), keepdims=True),
                        atol=1e-5, rtol=1e-5)

    # 3) Multi-chunk reduction with a masked partial last hw block (forced by
    #    a tiny block-byte budget): hw=1280 -> 3 chunks of 512 (last = 256).
    k3 = jax.random.fold_in(key, 2)
    x3 = jax.random.normal(k3, (2, 4, 32, 40), dtype=jnp.float32)
    out3 = jax.block_until_ready(
        fast_adaptive_avg_pool2d(x3, target_block_bytes=16 << 10))
    assert jnp.allclose(out3, jnp.mean(x3, axis=(2, 3), keepdims=True),
                        atol=1e-5, rtol=1e-4)

    print("KERNEL_OK")
</pallas_src>

<mosaic_0001>
module attributes {stable_mosaic.version = 11 : i64} {
  func.func @_avgpool_kernel(%arg0: i32, %arg1: i32, %arg2: memref<8x256xf32, #tpu.memory_space<vmem>>, %arg3: memref<8x1xf32, #tpu.memory_space<vmem>>, %arg4: memref<8x1xf32, #tpu.memory_space<vmem>>) attributes {dimension_semantics = [#tpu.dimension_semantics<parallel>, #tpu.dimension_semantics<arbitrary>], iteration_bounds = array<i64: 1, 1>, scalar_prefetch = 0 : i64, scratch_operands = 1 : i64, tpu.core_type = #tpu.core_type<tc>, window_params = [{transform_indices = @transform_0, window_bounds = array<i64: 8, 256>}, {transform_indices = @transform_1, window_bounds = array<i64: 8, 1>}]} {
    %c0_i32 = arith.constant 0 : i32
    %0 = arith.cmpi eq, %arg1, %c0_i32 : i32
    %1 = arith.extui %0 : i1 to i32
    %c0_i32_0 = arith.constant 0 : i32
    %2 = arith.cmpi ne, %1, %c0_i32_0 : i32
    scf.if %2 {
      %cst_8 = arith.constant 0.000000e+00 : f32
      %12 = vector.broadcast %cst_8 : f32 to vector<8x1xf32>
      %c0_9 = arith.constant 0 : index
      %c0_10 = arith.constant 0 : index
      %13 = vector.load %arg4[%c0_9, %c0_10] : memref<8x1xf32, #tpu.memory_space<vmem>>, vector<8x1xf32>
      tpu.vector_store %arg4[%c0_9, %c0_10], %12 {strides = array<i32>} : memref<8x1xf32, #tpu.memory_space<vmem>>, vector<8x1xf32>,
    } else {
    }
    %c0 = arith.constant 0 : index
    %c0_1 = arith.constant 0 : index
    %3 = vector.load %arg4[%c0, %c0_1] : memref<8x1xf32, #tpu.memory_space<vmem>>, vector<8x1xf32>
    %c0_2 = arith.constant 0 : index
    %c0_3 = arith.constant 0 : index
    %4 = vector.load %arg2[%c0_2, %c0_3] : memref<8x256xf32, #tpu.memory_space<vmem>>, vector<8x256xf32>
    %cst = arith.constant dense<0.000000e+00> : vector<8xf32>
    %5 = vector.multi_reduction <add>, %4, %cst [1] : vector<8x256xf32> to vector<8xf32>
    %6 = vector.shape_cast %5 : vector<8xf32> to vector<8x1xf32>
    %7 = arith.addf %3, %6 : vector<8x1xf32>
    %c0_4 = arith.constant 0 : index
    %c0_5 = arith.constant 0 : index
    %8 = vector.load %arg4[%c0_4, %c0_5] : memref<8x1xf32, #tpu.memory_space<vmem>>, vector<8x1xf32>
    tpu.vector_store %arg4[%c0_4, %c0_5], %7 {strides = array<i32>} : memref<8x1xf32, #tpu.memory_space<vmem>>, vector<8x1xf32>,
    %c0_i32_6 = arith.constant 0 : i32
    %9 = arith.cmpi eq, %arg1, %c0_i32_6 : i32
    %10 = arith.extui %9 : i1 to i32
    %c0_i32_7 = arith.constant 0 : i32
    %11 = arith.cmpi ne, %10, %c0_i32_7 : i32
    scf.if %11 {
      %c0_8 = arith.constant 0 : index
      %c0_9 = arith.constant 0 : index
      %12 = vector.load %arg4[%c0_8, %c0_9] : memref<8x1xf32, #tpu.memory_space<vmem>>, vector<8x1xf32>
      %cst_10 = arith.constant 3.906250e-03 : f32
      %13 = vector.broadcast %cst_10 : f32 to vector<8x1xf32>
      %14 = arith.mulf %12, %13 : vector<8x1xf32>
      %c0_11 = arith.constant 0 : index
      %c0_12 = arith.constant 0 : index
      %15 = vector.load %arg3[%c0_11, %c0_12] : memref<8x1xf32, #tpu.memory_space<vmem>>, vector<8x1xf32>
      tpu.vector_store %arg3[%c0_11, %c0_12], %14 {strides = array<i32>} : memref<8x1xf32, #tpu.memory_space<vmem>>, vector<8x1xf32>,
    } else {
    }
    return
  }
  func.func @transform_0(%arg0: i32, %arg1: i32) -> (i32, i32) {
    %c0_i32 = arith.constant 0 : i32
    return %arg0, %arg1 : i32, i32
  }
  func.func @transform_1(%arg0: i32, %arg1: i32) -> (i32, i32) {
    %c0_i32 = arith.constant 0 : i32
    %c0_i32_0 = arith.constant 0 : i32
    return %arg0, %c0_i32 : i32, i32
  }
}

</mosaic_0001>

<bundles_post_ra>
// kernel: tpu_custom_call.1
= control target key start
LH: loop header
LB: loop body
LE: loop exit
PB: predicated region body
PF: predicated region fallthrough
CT: control target
= control target key end

     0   :  { %6 = vsyncpa [#allocation4], 0  ;;  %s72_s6 = smov [#allocation3]   ;;  %s99_s0 = inlined_call_operand.hbm [shape: f32[8,256], index: 0, kind: input, shape index: {}]   ;;  %s100_s1 = inlined_call_operand.vmem [shape: f32[8,1], index: 1, kind: output, shape index: {}]  }
   0x1   :  { %s13_s7 = sshll.u32 %s72_s6, 4  ;;  %s48_s10 = scalar_lea.hbm %s99_s0, 256  ;;  %s14_s7 = int_to_ptr.vmem [resolvable:$true] %s13_s7 }
   0x2   :  { %p49_p0 = scmp.ne.s32.totalorder %s99_s0, %s48_s10  ;;  %p52_p1 = scmp.lt.u32.totalorder %s48_s10, %s99_s0 }
   0x4   :  { %p54_p2 = pnand %p52_p1, %p49_p0 }
   0x6   :  { %57 = shalt.err (!%p54_p2)
}
   0x7   :  { %s58_s15 = scalar_lea.vmem %s14_s7, 256  ;;  %p63_p4 = scmp.lt.s32.totalorder %s14_s7, %s14_s7 }
   0x8   :  { %p59_p3 = scmp.ne.s32.totalorder %s14_s7, %s58_s15  ;;  %p64_p5 = scmp.lt.s32.totalorder %s58_s15, %s58_s15 }
   0xa   :  { %p65_p6 = por %p64_p5, %p63_p4 }
   0xc   :  { %p66_p7 = pnand %p65_p6, %p59_p3 }
   0xe   :  { %69 = shalt.err (!%p66_p7)
}
   0xf   :  { %16 = dma.hbm_to_vmem [thread:$0]  %s99_s0, 256, %s14_s7, [#allocation4]  }
  0x10   :  { %70 = dma.done.wait [#allocation4], 256  }
  0x11   :  { %71 = vsyncadd [#allocation4], 4294967040  ;;  %vm24_vm0 = vcmask 7168   ;;  %v73_v0 = vmov 0.0   ;;  %v27_v1 = vld [vmem:[#allocation3] sm:$0xff]  ;;  %v28_v2 = vld [vmem:[#allocation3 + $0x8] sm:$0xff] }
  0x12   :  { %25 = vst.msk [vmem:[#allocation2] sm:$0xff] %vm24_vm0, %v73_v0  ;;  %v29_v3 = vadd.f32 %v28_v2, %v27_v1 }
  0x14   :  { %30 = vadd.xlane.f32.xlu0 %v29_v3 }
  0x19   :  { %v26_v4 = vld [vmem:[#allocation2] sm:$0xff] }
  0xa1   :  { %v31_v5 = vpop.xlane.xlu0 %30 }
  0xa2   :  { %v32_v6 = vadd.f32 %v31_v5, %v26_v4 }
  0xa4   :  { %34 = vst.msk [vmem:[#allocation2] sm:$0xff] %vm24_vm0, %v32_v6 }
  0xab   :  { %v38_v7 = vld [vmem:[#allocation2] sm:$0xff] }
  0xac   :  { %v39_v8 = vmul.f32 0.00390625, %v38_v7 }
  0xae   :  { %40 = vst.msk [vmem:[%s100_s1] sm:$0xff] %vm24_vm0, %v39_v8 }
  0xaf   :  { %45 = vsyncpa [#allocation4], 1 }

</bundles_post_ra>
